<compile_context>
chip_gen: v7x
topology: tpu7x:2x2x1
jax: 0.10.0
libtpu: 0.0.40
codegen_flags: <defaults>
</compile_context>

<pallas_src>
import functools

import jax
import jax.numpy as jnp
from jax import lax
from jax.experimental import pallas as pl
from jax.experimental.pallas import tpu as pltpu


def _round_up(x, m):
    return (x + m - 1) // m * m


def _vmem_capacity_bytes():
    """Physical VMEM per core; conservative 64 MiB (v7x-sized) if unknown."""
    try:
        return int(pltpu.get_tpu_info().vmem_capacity_bytes)
    except Exception:
        return 64 << 20


def _triplet_kernel(x_ref, t_col_ref, t_row_ref, sq_col_ref, sq_row_ref,
                    loss_ref, corr_ref, *scratch,
                    margin, n_real, bm, num_i, num_k):
    # pl.program_id is only used here, at the top level of the kernel; pl.when
    # bodies below only capture its *value* (interpret-safe and robust).
    row_start = pl.program_id(0) * bm if num_i > 1 else 0

    # LHS row block is a sublane-aligned slice of the (resident) RHS block:
    # no duplicate HBM fetch, no extra double-buffered VMEM input.
    lhs = x_ref[pl.ds(row_start, bm), :]                       # (bm, tk)

    # A.B^T on the MXU: contract the LAST axis of both operands (no transpose
    # of X is ever materialized); accumulate in f32.
    strip = lax.dot_general(
        lhs, x_ref[...],
        dimension_numbers=(((1,), (1,)), ((), ())),
        preferred_element_type=jnp.float32)                    # (bm, n_pad)

    def _mine_and_write(gram):
        tc = t_col_ref[...]            # (bm, 1)    i32
        tr = t_row_ref[...]            # (1, n_pad) i32
        sqc = sq_col_ref[...]          # (bm, 1)    f32
        sqr = sq_row_ref[...]          # (1, n_pad) f32
        n_pad = gram.shape[1]

        # Squared pairwise distances, clamped BEFORE mining (clamp and sqrt
        # are monotone, so extrema / values match the reference exactly).
        dist_sq = jnp.maximum(sqc + sqr - 2.0 * gram, 1e-12)

        same = tc == tr
        col_ids = lax.broadcasted_iota(jnp.int32, (1, n_pad), 1)
        col_ok = col_ids < n_real                              # mask padded cols
        pos_mask = jnp.logical_and(same, col_ok)
        neg_mask = jnp.logical_and(jnp.logical_not(same), col_ok)

        ap_sq = jnp.max(jnp.where(pos_mask, dist_sq, jnp.float32(-jnp.inf)),
                        axis=1, keepdims=True)                 # hardest positive
        an_sq = jnp.min(jnp.where(neg_mask, dist_sq, jnp.float32(jnp.inf)),
                        axis=1, keepdims=True)                 # hardest negative
        # sqrt only on 2*bm mined values, never on the full (bm, n) matrix.
        dist_ap = jnp.sqrt(ap_sq)
        dist_an = jnp.sqrt(an_sq)

        row_ids = row_start + lax.broadcasted_iota(jnp.int32, (bm, 1), 0)
        row_ok = row_ids < n_real                              # mask padded rows

        hinge = jnp.maximum(dist_ap - dist_an + jnp.float32(margin), 0.0)
        hinge = jnp.where(row_ok, hinge, 0.0)
        corr = jnp.where(jnp.logical_and(row_ok, dist_an >= dist_ap), 1, 0)

        # Lane-dense (1, 128) partial outputs, one tile per row block.
        loss_ref[...] = jnp.full(loss_ref.shape, jnp.sum(hinge),
                                 dtype=jnp.float32)
        corr_ref[...] = jnp.full(corr_ref.shape,
                                 jnp.sum(corr).astype(jnp.int32),
                                 dtype=jnp.int32)

    if num_k == 1:
        # Resident-RHS path: whole feature dim in one step, no scratch, no
        # pl.when, no reduction bookkeeping.
        _mine_and_write(strip)
    else:
        # Fallback for very large n*d: k-blocked reduction into an f32 VMEM
        # accumulator; mining happens on the last k step.
        k = pl.program_id(1)
        acc_ref = scratch[0]

        @pl.when(k == 0)
        def _():
            acc_ref[...] = strip

        @pl.when(k > 0)
        def _():
            acc_ref[...] += strip

        @pl.when(k == num_k - 1)
        def _():
            _mine_and_write(acc_ref[...])


def ori_triplet_loss(inputs, targets, margin=0.3, use_bf16_gram=False):
    """Forward of OriTripletLoss.

    inputs: (n, feat_dim) float features (f32 or bf16); targets: (n,) int labels.
    Returns (loss f32 scalar, correct i32 scalar).

    TODO(synk): rows whose label has no in-batch negative get dist_an = +inf
    (hinge 0, counted correct); the PyTorch masked-select version would error
    in that degenerate case.
    """
    n, d = inputs.shape

    gram_dtype = inputs.dtype
    if use_bf16_gram and inputs.dtype == jnp.float32:
        gram_dtype = jnp.bfloat16
    itemsize = jnp.dtype(gram_dtype).itemsize

    # ---- per-generation VMEM budget ---------------------------------------
    vmem_cap = _vmem_capacity_bytes()             # 64 MiB on v7x, 128 MiB else
    data_budget = (vmem_cap * 3) // 5             # leave headroom for Mosaic

    # ---- row-block (bm) selection -----------------------------------------
    n8 = _round_up(n, 8)
    if n8 < 256:
        bm = n8                                   # tiny batch: one row block
    else:
        # >= 2 row blocks so the "parallel" axis can feed both v7x TensorCores.
        bm = min(512, _round_up((n8 + 1) // 2, 128))
    # Keep the (bm, n_pad) f32 mining working set within ~half the budget.
    while bm > 128 and 8 * bm * _round_up(n8, bm) * 4 > data_budget // 2:
        bm = max(128, bm // 2)
    n_pad = _round_up(n8, bm)
    num_i = n_pad // bm

    # ---- feature-dim tiling (tk) ------------------------------------------
    mining_bytes = 8 * bm * n_pad * 4
    x_budget = max(data_budget - mining_bytes, 2 * n_pad * 128 * itemsize)
    d128 = _round_up(max(d, 1), 128)
    if 2 * n_pad * d128 * itemsize <= x_budget:
        # Whole X resident in VMEM: constant RHS block index, X read from HBM
        # exactly once for the entire kernel.
        tk = d_pad = d128
    else:
        # TODO(synk): for huge n*d a flash-style column-blocked (i, j, k) grid
        # would bound VMEM independent of n; not needed for typical batches.
        if x_budget >= 2 * n_pad * 512 * itemsize:
            tk = 512
        elif x_budget >= 2 * n_pad * 256 * itemsize:
            tk = 256
        else:
            tk = 128
        d_pad = _round_up(d, tk)
    num_k = d_pad // tk

    # ---- wrapper-side prep (zero padding leaves Gram / norms unchanged) ----
    xf32 = inputs.astype(jnp.float32)
    sq = jnp.sum(xf32 * xf32, axis=1)                         # exact f32 norms
    x = jnp.pad(inputs.astype(gram_dtype), ((0, n_pad - n), (0, d_pad - d)))
    t = jnp.pad(targets.astype(jnp.int32), (0, n_pad - n))
    sqp = jnp.pad(sq, (0, n_pad - n))

    t_col = t.reshape(n_pad, 1)
    t_row = t.reshape(1, n_pad)
    sq_col = sqp.reshape(n_pad, 1)
    sq_row = sqp.reshape(1, n_pad)

    # ---- VMEM limit: estimate need, clamp below physical capacity ----------
    est = (2 * n_pad * tk * itemsize                  # double-buffered X block
           + (bm * n_pad * 4 if num_k > 1 else 0)     # accumulator scratch
           + 8 * bm * n_pad * 4                       # live mining temps
           + (2 << 20))
    vmem_limit = int(min(vmem_cap - (4 << 20), max(32 << 20, int(est * 1.25))))

    kernel = functools.partial(_triplet_kernel, margin=float(margin),
                               n_real=n, bm=bm, num_i=num_i, num_k=num_k)
    scratch_shapes = ([pltpu.VMEM((bm, n_pad), jnp.float32)]
                      if num_k > 1 else [])

    loss_parts, corr_parts = pl.pallas_call(
        kernel,
        out_shape=(
            jax.ShapeDtypeStruct((1, num_i * 128), jnp.float32),
            jax.ShapeDtypeStruct((1, num_i * 128), jnp.int32),
        ),
        grid=(num_i, num_k),
        in_specs=[
            pl.BlockSpec((n_pad, tk), lambda i, k: (0, k)),   # X (resident RHS)
            pl.BlockSpec((bm, 1), lambda i, k: (i, 0)),       # labels, column
            pl.BlockSpec((1, n_pad), lambda i, k: (0, 0)),    # labels, row
            pl.BlockSpec((bm, 1), lambda i, k: (i, 0)),       # row norms, column
            pl.BlockSpec((1, n_pad), lambda i, k: (0, 0)),    # row norms, row
        ],
        out_specs=(
            pl.BlockSpec((1, 128), lambda i, k: (0, i)),
            pl.BlockSpec((1, 128), lambda i, k: (0, i)),
        ),
        scratch_shapes=scratch_shapes,
        compiler_params=pltpu.CompilerParams(
            dimension_semantics=("parallel", "arbitrary"),
            vmem_limit_bytes=vmem_limit),
    )(x, t_col, t_row, sq_col, sq_row)

    loss = jnp.sum(loss_parts.reshape(num_i, 128)[:, 0]) / jnp.float32(n)
    correct = jnp.sum(corr_parts.reshape(num_i, 128)[:, 0])
    return loss, correct


def _reference(inputs, targets, margin=0.3):
    # Pure-JAX reference mirroring the PyTorch forward.
    xf = inputs.astype(jnp.float32)
    sq = jnp.sum(xf ** 2, axis=1, keepdims=True)
    gram = jnp.dot(xf, xf.T, precision=lax.Precision.HIGHEST)
    dist = jnp.sqrt(jnp.maximum(sq + sq.T - 2.0 * gram, 1e-12))
    mask = targets[:, None] == targets[None, :]
    dist_ap = jnp.max(jnp.where(mask, dist, -jnp.inf), axis=1)
    dist_an = jnp.min(jnp.where(mask, jnp.inf, dist), axis=1)
    loss = jnp.mean(jnp.maximum(dist_ap - dist_an + margin, 0.0))
    correct = jnp.sum((dist_an >= dist_ap).astype(jnp.int32))
    return loss, correct


if __name__ == "__main__":
    key = jax.random.PRNGKey(0)
    n, feat_dim = 8, 32
    inputs = jax.random.normal(key, (n, feat_dim), dtype=jnp.float32)
    # 4 identities x 2 samples each, so every row has a positive and a negative.
    targets = jnp.array([0, 0, 1, 1, 2, 2, 3, 3], dtype=jnp.int32)

    loss, correct = ori_triplet_loss(inputs, targets, margin=0.3)
    jax.block_until_ready((loss, correct))

    ref_loss, ref_correct = _reference(inputs, targets, margin=0.3)
    assert jnp.allclose(loss, ref_loss, rtol=1e-3, atol=1e-3), (loss, ref_loss)
    assert int(correct) == int(ref_correct), (correct, ref_correct)

    print("KERNEL_OK")
</pallas_src>

<mosaic_0001>
module attributes {stable_mosaic.version = 11 : i64} {
  func.func @_triplet_kernel(%arg0: i32, %arg1: i32, %arg2: memref<8x128xf32, #tpu.memory_space<vmem>>, %arg3: memref<8x1xi32, #tpu.memory_space<vmem>>, %arg4: memref<1x8xi32, #tpu.memory_space<vmem>>, %arg5: memref<8x1xf32, #tpu.memory_space<vmem>>, %arg6: memref<1x8xf32, #tpu.memory_space<vmem>>, %arg7: memref<1x128xf32, #tpu.memory_space<vmem>>, %arg8: memref<1x128xi32, #tpu.memory_space<vmem>>) attributes {dimension_semantics = [#tpu.dimension_semantics<parallel>, #tpu.dimension_semantics<arbitrary>], iteration_bounds = array<i64: 1, 1>, scalar_prefetch = 0 : i64, scratch_operands = 0 : i64, tpu.core_type = #tpu.core_type<tc>, window_params = [{transform_indices = @transform_0, window_bounds = array<i64: 8, 128>}, {transform_indices = @transform_1, window_bounds = array<i64: 8, 1>}, {pipeline_mode = #tpu.pipeline_mode<synchronous>, transform_indices = @transform_2, window_bounds = array<i64: 1, 8>}, {transform_indices = @transform_3, window_bounds = array<i64: 8, 1>}, {pipeline_mode = #tpu.pipeline_mode<synchronous>, transform_indices = @transform_4, window_bounds = array<i64: 1, 8>}, {transform_indices = @transform_5, window_bounds = array<i64: 1, 128>}, {transform_indices = @transform_6, window_bounds = array<i64: 1, 128>}]} {
    %c0 = arith.constant 0 : index
    %c0_0 = arith.constant 0 : index
    %0 = vector.load %arg2[%c0, %c0_0] : memref<8x128xf32, #tpu.memory_space<vmem>>, vector<8x128xf32>
    %c0_1 = arith.constant 0 : index
    %c0_2 = arith.constant 0 : index
    %1 = vector.load %arg2[%c0_1, %c0_2] : memref<8x128xf32, #tpu.memory_space<vmem>>, vector<8x128xf32>
    %cst = arith.constant dense<0.000000e+00> : vector<8x8xf32>
    %2 = tpu.matmul %0, %1, %cst {dimension_numbers = #tpu.dot_dimension_numbers<[1], [1], [0], [0], [0, 0, 1, 0], [], []>} : vector<8x128xf32>, vector<8x128xf32>, vector<8x8xf32> -> vector<8x8xf32>
    %c0_3 = arith.constant 0 : index
    %c0_4 = arith.constant 0 : index
    %3 = vector.load %arg3[%c0_3, %c0_4] : memref<8x1xi32, #tpu.memory_space<vmem>>, vector<8x1xi32>
    %c0_5 = arith.constant 0 : index
    %c0_6 = arith.constant 0 : index
    %4 = vector.load %arg4[%c0_5, %c0_6] : memref<1x8xi32, #tpu.memory_space<vmem>>, vector<1x8xi32>
    %c0_7 = arith.constant 0 : index
    %c0_8 = arith.constant 0 : index
    %5 = vector.load %arg5[%c0_7, %c0_8] : memref<8x1xf32, #tpu.memory_space<vmem>>, vector<8x1xf32>
    %c0_9 = arith.constant 0 : index
    %c0_10 = arith.constant 0 : index
    %6 = vector.load %arg6[%c0_9, %c0_10] : memref<1x8xf32, #tpu.memory_space<vmem>>, vector<1x8xf32>
    %7 = vector.broadcast %5 : vector<8x1xf32> to vector<8x8xf32>
    %8 = vector.broadcast %6 : vector<1x8xf32> to vector<8x8xf32>
    %9 = arith.addf %7, %8 : vector<8x8xf32>
    %cst_11 = arith.constant 2.000000e+00 : f32
    %10 = vector.broadcast %cst_11 : f32 to vector<8x8xf32>
    %11 = arith.mulf %10, %2 : vector<8x8xf32>
    %12 = arith.subf %9, %11 : vector<8x8xf32>
    %cst_12 = arith.constant 9.99999996E-13 : f32
    %13 = vector.broadcast %cst_12 : f32 to vector<8x8xf32>
    %14 = arith.maximumf %12, %13 : vector<8x8xf32>
    %15 = vector.broadcast %3 : vector<8x1xi32> to vector<8x8xi32>
    %16 = vector.broadcast %4 : vector<1x8xi32> to vector<8x8xi32>
    %17 = arith.cmpi eq, %15, %16 : vector<8x8xi32>
    %18 = tpu.iota {dimensions = array<i32: 1>} : vector<1x8xi32>
    %c8_i32 = arith.constant 8 : i32
    %19 = vector.broadcast %c8_i32 : i32 to vector<1x8xi32>
    %20 = arith.cmpi slt, %18, %19 : vector<1x8xi32>
    %21 = vector.broadcast %20 : vector<1x8xi1> to vector<8x8xi1>
    %22 = arith.andi %17, %21 : vector<8x8xi1>
    %cst_13 = arith.constant dense<true> : vector<8x8xi1>
    %23 = arith.xori %17, %cst_13 : vector<8x8xi1>
    %24 = vector.broadcast %20 : vector<1x8xi1> to vector<8x8xi1>
    %25 = arith.andi %23, %24 : vector<8x8xi1>
    %cst_14 = arith.constant 0xFF800000 : f32
    %26 = vector.broadcast %cst_14 : f32 to vector<8x8xf32>
    %27 = arith.select %22, %14, %26 : vector<8x8xi1>, vector<8x8xf32>
    %cst_15 = arith.constant dense<0xFF800000> : vector<8xf32>
    %28 = vector.multi_reduction <maximumf>, %27, %cst_15 [1] : vector<8x8xf32> to vector<8xf32>
    %29 = vector.shape_cast %28 : vector<8xf32> to vector<8x1xf32>
    %cst_16 = arith.constant 0x7F800000 : f32
    %30 = vector.broadcast %cst_16 : f32 to vector<8x8xf32>
    %31 = arith.select %25, %14, %30 : vector<8x8xi1>, vector<8x8xf32>
    %cst_17 = arith.constant dense<0x7F800000> : vector<8xf32>
    %32 = vector.multi_reduction <minimumf>, %31, %cst_17 [1] : vector<8x8xf32> to vector<8xf32>
    %33 = vector.shape_cast %32 : vector<8xf32> to vector<8x1xf32>
    %34 = math.sqrt %29 : vector<8x1xf32>
    %35 = math.sqrt %33 : vector<8x1xf32>
    %36 = tpu.iota {dimensions = array<i32: 0>} : vector<8x1xi32>
    %c0_i32 = arith.constant 0 : i32
    %37 = vector.broadcast %c0_i32 : i32 to vector<8x1xi32>
    %38 = arith.addi %37, %36 : vector<8x1xi32>
    %c8_i32_18 = arith.constant 8 : i32
    %39 = vector.broadcast %c8_i32_18 : i32 to vector<8x1xi32>
    %40 = arith.cmpi slt, %38, %39 : vector<8x1xi32>
    %41 = arith.subf %34, %35 : vector<8x1xf32>
    %cst_19 = arith.constant 3.000000e-01 : f32
    %42 = vector.broadcast %cst_19 : f32 to vector<8x1xf32>
    %43 = arith.addf %41, %42 : vector<8x1xf32>
    %cst_20 = arith.constant 0.000000e+00 : f32
    %44 = vector.broadcast %cst_20 : f32 to vector<8x1xf32>
    %45 = arith.maximumf %43, %44 : vector<8x1xf32>
    %cst_21 = arith.constant 0.000000e+00 : f32
    %46 = vector.broadcast %cst_21 : f32 to vector<8x1xf32>
    %47 = arith.select %40, %45, %46 : vector<8x1xi1>, vector<8x1xf32>
    %48 = arith.cmpf oge, %35, %34 : vector<8x1xf32>
    %49 = arith.andi %40, %48 : vector<8x1xi1>
    %c1_i32 = arith.constant 1 : i32
    %c0_i32_22 = arith.constant 0 : i32
    %50 = vector.broadcast %c1_i32 : i32 to vector<8x1xi32>
    %51 = vector.broadcast %c0_i32_22 : i32 to vector<8x1xi32>
    %52 = arith.select %49, %50, %51 : vector<8x1xi1>, vector<8x1xi32>
    %53 = vector.shape_cast %47 : vector<8x1xf32> to vector<1x8x1xf32>
    %cst_23 = arith.constant dense<0.000000e+00> : vector<1xf32>
    %54 = vector.multi_reduction <add>, %53, %cst_23 [1, 2] : vector<1x8x1xf32> to vector<1xf32>
    %55 = vector.shape_cast %54 : vector<1xf32> to vector<1x1x1xf32>
    %56 = vector.extract %55[0, 0, 0] : f32 from vector<1x1x1xf32>
    %57 = vector.broadcast %56 : f32 to vector<1x128xf32>
    %c0_24 = arith.constant 0 : index
    %c0_25 = arith.constant 0 : index
    %58 = vector.load %arg7[%c0_24, %c0_25] : memref<1x128xf32, #tpu.memory_space<vmem>>, vector<1x128xf32>
    tpu.vector_store %arg7[%c0_24, %c0_25], %57 {strides = array<i32>} : memref<1x128xf32, #tpu.memory_space<vmem>>, vector<1x128xf32>,
    %59 = vector.shape_cast %52 : vector<8x1xi32> to vector<1x8x1xi32>
    %cst_26 = arith.constant dense<0> : vector<1xi32>
    %60 = vector.multi_reduction <add>, %59, %cst_26 [1, 2] : vector<1x8x1xi32> to vector<1xi32>
    %61 = vector.shape_cast %60 : vector<1xi32> to vector<1x1x1xi32>
    %62 = vector.extract %61[0, 0, 0] : i32 from vector<1x1x1xi32>
    %63 = vector.broadcast %62 : i32 to vector<1x128xi32>
    %c0_27 = arith.constant 0 : index
    %c0_28 = arith.constant 0 : index
    %64 = vector.load %arg8[%c0_27, %c0_28] : memref<1x128xi32, #tpu.memory_space<vmem>>, vector<1x128xi32>
    tpu.vector_store %arg8[%c0_27, %c0_28], %63 {strides = array<i32>} : memref<1x128xi32, #tpu.memory_space<vmem>>, vector<1x128xi32>,
    return
  }
  func.func @transform_0(%arg0: i32, %arg1: i32) -> (i32, i32) {
    %c0_i32 = arith.constant 0 : i32
    %c0_i32_0 = arith.constant 0 : i32
    return %c0_i32, %arg1 : i32, i32
  }
  func.func @transform_1(%arg0: i32, %arg1: i32) -> (i32, i32) {
    %c0_i32 = arith.constant 0 : i32
    %c0_i32_0 = arith.constant 0 : i32
    return %arg0, %c0_i32 : i32, i32
  }
  func.func @transform_2(%arg0: i32, %arg1: i32) -> (i32, i32) {
    %c0_i32 = arith.constant 0 : i32
    %c0_i32_0 = arith.constant 0 : i32
    %c0_i32_1 = arith.constant 0 : i32
    return %c0_i32, %c0_i32_0 : i32, i32
  }
  func.func @transform_3(%arg0: i32, %arg1: i32) -> (i32, i32) {
    %c0_i32 = arith.constant 0 : i32
    %c0_i32_0 = arith.constant 0 : i32
    return %arg0, %c0_i32 : i32, i32
  }
  func.func @transform_4(%arg0: i32, %arg1: i32) -> (i32, i32) {
    %c0_i32 = arith.constant 0 : i32
    %c0_i32_0 = arith.constant 0 : i32
    %c0_i32_1 = arith.constant 0 : i32
    return %c0_i32, %c0_i32_0 : i32, i32
  }
  func.func @transform_5(%arg0: i32, %arg1: i32) -> (i32, i32) {
    %c0_i32 = arith.constant 0 : i32
    %c0_i32_0 = arith.constant 0 : i32
    return %c0_i32, %arg0 : i32, i32
  }
  func.func @transform_6(%arg0: i32, %arg1: i32) -> (i32, i32) {
    %c0_i32 = arith.constant 0 : i32
    %c0_i32_0 = arith.constant 0 : i32
    return %c0_i32, %arg0 : i32, i32
  }
}

</mosaic_0001>

<bundles_post_ra>
// kernel: tpu_custom_call.1
= control target key start
LH: loop header
LB: loop body
LE: loop exit
PB: predicated region body
PF: predicated region fallthrough
CT: control target
= control target key end

     0   :  { %12 = vsyncpa [#allocation3], 0  ;;  %v285_v2 = vmov 0.0   ;;  %vm286_vm0 = vmmov 0   ;;  %s373_s0 = inlined_call_operand.vmem [shape: f32[8,128], index: 0, kind: input, shape index: {}]   ;;  %s374_s1 = inlined_call_operand.vmem [shape: s32[8,1], index: 1, kind: input, shape index: {}]   ;;  %s375_s2 = inlined_call_operand.vmem [shape: s32[1,8], index: 2, kind: input, shape index: {}]   ;;  %s376_s3 = inlined_call_operand.vmem [shape: f32[8,1], index: 3, kind: input, shape index: {}]   ;;  %s377_s4 = inlined_call_operand.vmem [shape: f32[1,8], index: 4, kind: input, shape index: {}]   ;;  %s378_s5 = inlined_call_operand.hbm [shape: f32[1,128], index: 5, kind: output, shape index: {0}]   ;;  %s379_s6 = inlined_call_operand.hbm [shape: s32[1,128], index: 6, kind: output, shape index: {1}]  }
   0x1   :  { %v24_v0 = vld [vmem:[%s373_s0] sm:$0xff]  ;;  %217 = vmatprep.subr.mxu0 %v285_v2  ;;  %219 = vmatprep.mubr.msk.f32.mxu0 %vm286_vm0, %v285_v2 }
   0x2   :  { %v97_v1 = vld [vmem:[%s376_s3] sm:$0xff] }
   0x3   :  { %13 = vsyncpa [#allocation5], 0  ;;  %218 = vmatpush3.xpose.msra.mxu0 %v24_v0  ;;  %v287_v3 = vmov 0   ;;  %v95_v4 = vld [vmem:[%s374_s1] sm:$0xff]  ;;  %v122_v6 = vlaneseq  ;;  %vm288_vm3 = vmmov 1   ;;  %vm131_vm5 = vcmask 64512  }
   0x4   :  { %232 = vset.pattern.permute.xlu0 %v287_v3  ;;  %v213_v7 = vld [vmem:[%s377_s4] ss:$0 sm:$0xff]  ;;  %vm163_vm13 = vcmask 7168   ;;  %s289_s1 = smov [#allocation2]   ;;  %s290_s4 = smov [#allocation4]  }
   0x5   :  { %101 = vperm.xlu0 %232, %v97_v1   ;;  %v214_v9 = vld [vmem:[%s375_s2] ss:$0 sm:$0xff]  ;;  %v123_v10 = vand.u32 127, %v122_v6  ;;  %s191_s2 = sshll.u32 %s289_s1, 4  ;;  %s201_s29 = sshll.u32 %s290_s4, 4  ;;  %s192_s2 = int_to_ptr.vmem [resolvable:$true] %s191_s2  ;;  %s341_s29 = int_to_ptr.vmem [resolvable:$true] %s201_s29 }
   0x6   :  { %220 = vmatmul.mubr.f32.vlgmr.msra.gmra.mrb[0].mxu0 %v24_v0  ;;  %s237_s8 = scalar_lea.vmem %s192_s2, 16  ;;  %s241_s9 = scalar_lea.vmem %s192_s2, 32 }
   0x7   :  { %vm124_vm2 = vcmp.lt.s32.totalorder %v123_v10, 8  ;;  %p238_p0 = scmp.ne.s32.totalorder %s192_s2, %s237_s8  ;;  %p242_p1 = scmp.lt.s32.totalorder %s192_s2, %s192_s2 }
   0x8   :  { %p243_p2 = scmp.lt.s32.totalorder %s241_s9, %s237_s8 }
   0x9   :  { %115 = vperm.xlu0 %232, %v95_v4  }
   0xa   :  { %p244_p3 = por %p243_p2, %p242_p1 }
   0xc   :  { %p245_p4 = pnand %p244_p3, %p238_p0 }
  0x84   :  { %v102_v5 = vpop.permute.xlu0 %101 }
  0x85   :  { %v110_v8 = vadd.f32 %v213_v7, %v102_v5 }
  0x88   :  { %v116_v11 = vpop.permute.xlu0 %115 }
  0x89   :  { %vm121_vm1 = vcmp.eq.s32.totalorder %v116_v11, %v214_v9 }
  0x8a   :  { %vm128_vm4 = vmxor %vm121_vm1, %vm288_vm3 }
  0x8b   :  { %vm127_vm6 = vmand %vm121_vm1, %vm124_vm2 }
  0x8c   :  { %vm129_vm7 = vmand %vm128_vm4, %vm124_vm2 }
  0xd9   :  { %v91_v12 = vpop.f32.mrb[0].mxu0 }
  0xda   :  { %v111_v13 = vmul.f32 2.0, %v91_v12  ;;  %v221_v14 = vpop.f32.mrb[1].mxu0 }
  0xdc   :  { %v112_v15 = vsub.f32 %v110_v8, %v111_v13 }
  0xde   :  { %v113_v16 = vmax.f32 %v112_v15, 1e-12 }
  0xe0   :  { %v130_v17 = vsel %vm127_vm6, %v113_v16, -inf  ;;  %v135_v19 = vsel %vm129_vm7, %v113_v16, inf }
  0xe1   :  { %v132_v18 = vsel %vm131_vm5, %v130_v17, -inf  ;;  %v136_v20 = vsel %vm131_vm5, %v135_v19, inf }
  0xe2   :  { %133 = vmax.xlane.f32.xlu1 %v132_v18 }
  0xe6   :  { %137 = vmin.xlane.f32.xlu1 %v136_v20 }
 0x16f   :  { %v134_v21 = vpop.xlane.xlu1 %133 }
 0x170   :  { %233 = vrsqrt.f32 %v134_v21  ;;  %vm141_vm8 = vcmp.eq.f32.partialorder %v134_v21, inf  ;;  %v144_v29 = vand.u32 2147483648, %v134_v21  ;;  %vm143_vm10 = vcmp.eq.f32.partialorder %v134_v21, 0.0 }
 0x173   :  { %v138_v22 = vpop.xlane.xlu1 %137 }
 0x174   :  { %235 = vrsqrt.f32 %v138_v22  ;;  %vm148_vm9 = vcmp.eq.f32.partialorder %v138_v22, inf  ;;  %v151_v28 = vand.u32 2147483648, %v138_v22  ;;  %vm150_vm11 = vcmp.eq.f32.partialorder %v138_v22, 0.0 }
 0x17a   :  { %v234_v23 = vpop.eup %233 }
 0x17b   :  { %v140_v24 = vmul.f32 %v234_v23, %v134_v21 }
 0x17d   :  { %v142_v27 = vsel %vm141_vm8, %v134_v21, %v140_v24 }
 0x17e   :  { %v236_v25 = vpop.eup %235  ;;  %v145_v31 = vsel %vm143_vm10, %v144_v29, %v142_v27 }
 0x17f   :  { %v147_v26 = vmul.f32 %v236_v25, %v138_v22 }
 0x181   :  { %v149_v30 = vsel %vm148_vm9, %v138_v22, %v147_v26 }
 0x182   :  { %v152_v32 = vsel %vm150_vm11, %v151_v28, %v149_v30 }
 0x183   :  { %v156_v33 = vsub.f32 %v145_v31, %v152_v32  ;;  %vm160_vm12 = vcmp.ge.f32.partialorder %v152_v32, %v145_v31 }
 0x184   :  { %v162_v37 = vsel %vm160_vm12, 1, %v287_v3 }
 0x185   :  { %v157_v34 = vadd.f32 0.3, %v156_v33  ;;  %v176_v38 = vrot.slane %v162_v37, 4 }
 0x187   :  { %v158_v35 = vmax.f32 %v157_v34, 0.0  ;;  %v177_v39 = vadd.s32 %v176_v38, %v162_v37 }
 0x189   :  { %v164_v36 = vsel %vm163_vm13, %v158_v35, 0.0  ;;  %v178_v41 = vrot.slane %v177_v39, 2 }
 0x18a   :  { %165 = vadd.xlane.f32.xlu0 %v164_v36 }
 0x18b   :  { %v179_v44 = vadd.s32 %v178_v41, %v177_v39 }
 0x18d   :  { %v180_v47 = vrot.slane %v179_v44, 1 }
 0x18f   :  { %v181_v50 = vadd.s32 %v180_v47, %v179_v44 }
 0x217   :  { %v166_v40 = vpop.xlane.xlu0 %165 }
 0x218   :  { %v167_v42 = vrot.slane %v166_v40, 4 }
 0x21a   :  { %v168_v43 = vadd.f32 %v167_v42, %v166_v40 }
 0x21c   :  { %v169_v45 = vrot.slane %v168_v43, 2 }
 0x21e   :  { %v170_v46 = vadd.f32 %v169_v45, %v168_v43 }
 0x220   :  { %v171_v48 = vrot.slane %v170_v46, 1 }
 0x222   :  { %v172_v49 = vadd.f32 %v171_v48, %v170_v46 }
 0x224   :  { %222 = vpush %v172_v49 }
 0x225   :  { %224 = vpush %v181_v50 }
 0x255   :  { %s223_s30 = spop %222 }
 0x256   :  { %v174_v51 = vstv %s223_s30  ;;  %s225_s7 = spop %224 }
 0x257   :  { %175 = vst [vmem:[#allocation2] sm:$0x1] %v174_v51  ;;  %v183_v52 = vstv %s225_s7 }
 0x258   :  { %184 = vst [vmem:[#allocation4] sm:$0x1] %v183_v52 }
 0x259   :  { %248 = shalt.err (!%p245_p4)
}
 0x25a   :  { %s249_s12 = scalar_lea.hbm %s378_s5, 16 }
 0x25b   :  { %p250_p5 = scmp.ne.s32.totalorder %s378_s5, %s249_s12  ;;  %p253_p6 = scmp.lt.u32.totalorder %s249_s12, %s378_s5 }
 0x25d   :  { %p255_p7 = pnand %p253_p6, %p250_p5 }
 0x25f   :  { %258 = shalt.err (!%p255_p7)
}
 0x260   :  { %194 = dma.vmem_to_hbm [thread:$0]  %s192_s2, 16, %s378_s5, [#allocation3]  }
 0x261   :  { %s259_s19 = scalar_lea.vmem %s341_s29, 16  ;;  %s263_s20 = scalar_lea.vmem %s341_s29, 32 }
 0x262   :  { %p260_p8 = scmp.ne.s32.totalorder %s341_s29, %s259_s19  ;;  %p264_p9 = scmp.lt.s32.totalorder %s341_s29, %s341_s29 }
 0x263   :  { %p265_p10 = scmp.lt.s32.totalorder %s263_s20, %s259_s19 }
 0x265   :  { %p266_p11 = por %p265_p10, %p264_p9 }
 0x267   :  { %p267_p12 = pnand %p266_p11, %p260_p8 }
 0x269   :  { %270 = shalt.err (!%p267_p12)
}
 0x26a   :  { %s271_s23 = scalar_lea.hbm %s379_s6, 16 }
 0x26b   :  { %p272_p13 = scmp.ne.s32.totalorder %s379_s6, %s271_s23  ;;  %p275_p0 = scmp.lt.u32.totalorder %s271_s23, %s379_s6 }
 0x26d   :  { %p277_p1 = pnand %p275_p0, %p272_p13 }
 0x26f   :  { %280 = shalt.err (!%p277_p1)
}
 0x270   :  { %204 = dma.vmem_to_hbm [thread:$0]  %s341_s29, 16, %s379_s6, [#allocation5]  }
 0x271   :  { %281 = dma.done.wait [#allocation3], 16  }
 0x272   :  { %282 = vsyncadd [#allocation3], 4294967280 }
 0x273   :  { %283 = dma.done.wait [#allocation5], 16  }
 0x274   :  { %284 = vsyncadd [#allocation5], 4294967280 }
 0x275   :  { %211 = vsyncpa [#allocation3], 1 }
 0x276   :  { %212 = vsyncpa [#allocation5], 1 }

</bundles_post_ra>
